<compile_context>
chip_gen: v7x
topology: tpu7x:2x2x1
jax: 0.10.0
libtpu: 0.0.40
codegen_flags: <defaults>
</compile_context>

<pallas_src>
import jax
import jax.numpy as jnp
from jax.experimental import pallas as pl
from jax.experimental.pallas import tpu as pltpu


def _cdiv(a, m):
    return (a + m - 1) // m


def _round_up(a, m):
    return _cdiv(a, m) * m


def mlp1_kernel(x_ref, w_ref, b_ref, o_ref):
    # x_ref: (TN, D) f32 VMEM   w_ref: (8, D) f32 VMEM (row-replicated weight)
    # b_ref: (1,)   f32 SMEM    o_ref: (1, TN) f32 VMEM (lane-dense batch row)
    #
    # MXU dot, contracting both operands' last dim (q @ k.T pattern):
    # (8, D) x (TN, D)^T -> (8, TN); all 8 rows are identical, keep row 0.
    z = jax.lax.dot_general(
        w_ref[...], x_ref[...],
        dimension_numbers=(((1,), (1,)), ((), ())),
        preferred_element_type=jnp.float32,
        precision=jax.lax.Precision.HIGHEST,   # exact-f32 matmul passes
    )
    zb = z[0:1, :] + b_ref[0]
    # Exact sigmoid (EUP exp + f32 divide) -- no approx reciprocal.
    o_ref[...] = 1.0 / (1.0 + jnp.exp(-zb))


def _choose_tile_rows(n, d, *, target_bytes=4 << 20, min_grid=4, max_rows=32768):
    """Batch-tile height: byte-sized (~4 MiB x tile), multiple of 128 so the
    lane-dense (1, TN) output block is legal, capped so the grid keeps at
    least ~min_grid steps (v7x megacore) and VMEM stays well under budget."""
    if n < 1024:
        return n  # single block; block dims == full array dims (always legal)
    by_bytes = max(128, (target_bytes // (4 * d)) // 128 * 128)
    by_grid = max(128, _round_up(_cdiv(n, min_grid), 128))
    return max(128, min(by_bytes, by_grid, max_rows))


def mlp1_forward(x, w, b):
    """Equivalent of torch: squeeze(sigmoid(Linear(D, 1)(x))).

    x: (N, D) f32, w: (1, D) torch-Linear weight, b: (1,) bias.
    """
    n, d = x.shape
    w_row = jnp.asarray(w, jnp.float32).reshape(1, d)
    w8 = jnp.tile(w_row, (8, 1))                       # (8, D): MXU-friendly LHS
    b_sc = jnp.asarray(b, jnp.float32).reshape(1)      # SMEM scalar

    tn = _choose_tile_rows(n, d)
    grid = pl.cdiv(n, tn)                              # partial last block OK

    out = pl.pallas_call(
        mlp1_kernel,
        out_shape=jax.ShapeDtypeStruct((1, n), jnp.float32),
        grid=(grid,),
        in_specs=[
            pl.BlockSpec((tn, d), lambda i: (i, 0)),               # x tile
            pl.BlockSpec((8, d), lambda i: (0, 0)),                # weight (resident)
            pl.BlockSpec(memory_space=pltpu.MemorySpace.SMEM),     # bias scalar
        ],
        out_specs=pl.BlockSpec((1, tn), lambda i: (0, i)),         # lane-dense row
        compiler_params=pltpu.CompilerParams(
            dimension_semantics=("parallel",)),                    # v7x megacore
    )(x, w8, b_sc)

    # torch.squeeze semantics: (N,) for N > 1, 0-d scalar for N == 1.
    return jnp.squeeze(out)


if __name__ == "__main__":
    key = jax.random.PRNGKey(0)
    kx, kw, kb = jax.random.split(key, 3)

    batch, input_size = 8, 32
    x = jax.random.normal(kx, (batch, input_size), dtype=jnp.float32)

    # Deterministic init mimicking torch.nn.Linear: U(-1/sqrt(D), 1/sqrt(D))
    bound = 1.0 / jnp.sqrt(jnp.float32(input_size))
    w = jax.random.uniform(kw, (1, input_size), jnp.float32, -bound, bound)
    b = jax.random.uniform(kb, (1,), jnp.float32, -bound, bound)

    y = mlp1_forward(x, w, b)
    jax.block_until_ready(y)

    # Exact-f32 reference (elementwise multiply + reduce avoids any
    # default-precision matmul fuzz on the reference side).
    y_ref = jax.nn.sigmoid(jnp.sum(x * w[0], axis=-1) + b[0])
    assert y.shape == (batch,), y.shape
    assert jnp.allclose(y, y_ref, atol=1e-4, rtol=1e-4), (y, y_ref)

    print("KERNEL_OK")
</pallas_src>

<mosaic_0001>
module attributes {stable_mosaic.version = 11 : i64} {
  func.func @mlp1_kernel(%arg0: i32, %arg1: memref<8x32xf32, #tpu.memory_space<vmem>>, %arg2: memref<8x32xf32, #tpu.memory_space<vmem>>, %arg3: memref<1xf32, #tpu.memory_space<smem>>, %arg4: memref<1x8xf32, #tpu.memory_space<vmem>>) attributes {dimension_semantics = [#tpu.dimension_semantics<parallel>], iteration_bounds = array<i64: 1>, scalar_prefetch = 0 : i64, scratch_operands = 0 : i64, tpu.core_type = #tpu.core_type<tc>, window_params = [{transform_indices = @transform_0, window_bounds = array<i64: 8, 32>}, {pipeline_mode = #tpu.pipeline_mode<synchronous>, transform_indices = @transform_1, window_bounds = array<i64: 8, 32>}, {transform_indices = @transform_2, window_bounds = array<i64: 1>}, {transform_indices = @transform_3, window_bounds = array<i64: 1, 8>}]} {
    %c0 = arith.constant 0 : index
    %c0_0 = arith.constant 0 : index
    %0 = vector.load %arg2[%c0, %c0_0] : memref<8x32xf32, #tpu.memory_space<vmem>>, vector<8x32xf32>
    %c0_1 = arith.constant 0 : index
    %c0_2 = arith.constant 0 : index
    %1 = vector.load %arg1[%c0_1, %c0_2] : memref<8x32xf32, #tpu.memory_space<vmem>>, vector<8x32xf32>
    %cst = arith.constant dense<0.000000e+00> : vector<8x8xf32>
    %2 = tpu.matmul %0, %1, %cst {dimension_numbers = #tpu.dot_dimension_numbers<[1], [1], [0], [0], [0, 0, 1, 0], [], []>, precision = #tpu.contract_precision<fp32>} : vector<8x32xf32>, vector<8x32xf32>, vector<8x8xf32> -> vector<8x8xf32>
    %3 = vector.extract_strided_slice %2 {offsets = [0, 0], sizes = [1, 8], strides = [1, 1]} : vector<8x8xf32> to vector<1x8xf32>
    %c0_3 = arith.constant 0 : index
    %4 = memref.load %arg3[%c0_3] : memref<1xf32, #tpu.memory_space<smem>>
    %5 = vector.broadcast %4 : f32 to vector<1x8xf32>
    %6 = arith.addf %3, %5 : vector<1x8xf32>
    %cst_4 = arith.constant 0.000000e+00 : f32
    %7 = vector.broadcast %cst_4 : f32 to vector<1x8xf32>
    %8 = arith.subf %7, %6 : vector<1x8xf32>
    %9 = math.exp %8 : vector<1x8xf32>
    %cst_5 = arith.constant 1.000000e+00 : f32
    %10 = vector.broadcast %cst_5 : f32 to vector<1x8xf32>
    %11 = arith.addf %10, %9 : vector<1x8xf32>
    %cst_6 = arith.constant 1.000000e+00 : f32
    %12 = vector.broadcast %cst_6 : f32 to vector<1x8xf32>
    %13 = arith.divf %12, %11 : vector<1x8xf32>
    %c0_7 = arith.constant 0 : index
    %c0_8 = arith.constant 0 : index
    %14 = vector.load %arg4[%c0_7, %c0_8] : memref<1x8xf32, #tpu.memory_space<vmem>>, vector<1x8xf32>
    tpu.vector_store %arg4[%c0_7, %c0_8], %13 {strides = array<i32>} : memref<1x8xf32, #tpu.memory_space<vmem>>, vector<1x8xf32>,
    return
  }
  func.func @transform_0(%arg0: i32) -> (i32, i32) {
    %c0_i32 = arith.constant 0 : i32
    %c0_i32_0 = arith.constant 0 : i32
    return %arg0, %c0_i32 : i32, i32
  }
  func.func @transform_1(%arg0: i32) -> (i32, i32) {
    %c0_i32 = arith.constant 0 : i32
    %c0_i32_0 = arith.constant 0 : i32
    %c0_i32_1 = arith.constant 0 : i32
    return %c0_i32, %c0_i32_0 : i32, i32
  }
  func.func @transform_2(%arg0: i32) -> i32 {
    %c0_i32 = arith.constant 0 : i32
    %c0_i32_0 = arith.constant 0 : i32
    return %c0_i32 : i32
  }
  func.func @transform_3(%arg0: i32) -> (i32, i32) {
    %c0_i32 = arith.constant 0 : i32
    %c0_i32_0 = arith.constant 0 : i32
    return %c0_i32, %arg0 : i32, i32
  }
}

</mosaic_0001>

<bundles_post_ra>
// kernel: tpu_custom_call.1
= control target key start
LH: loop header
LB: loop body
LE: loop exit
PB: predicated region body
PF: predicated region fallthrough
CT: control target
= control target key end

     0   :  { %9 = vsyncpa [#allocation4], 0  ;;  %s715_s0 = inlined_call_operand.hbm [shape: f32[8,32], index: 0, kind: input, shape index: {}]   ;;  %s716_s1 = inlined_call_operand.hbm [shape: f32[8,32], index: 1, kind: input, shape index: {}]   ;;  %s717_s2 = inlined_call_operand.<no memory space> [shape: f32[1], index: 2, kind: input, shape index: {}]   ;;  %s718_s3 = inlined_call_operand.hbm [shape: f32[1,8], index: 3, kind: output, shape index: {}]  }
   0x1   :  { %10 = vsyncpa [#allocation7], 0 }
   0x2   :  { %11 = vsyncpa [#allocation5], 0  ;;  %s645_s12 = smov [#allocation3]   ;;  %s646_s14 = smov [#allocation6]  }
   0x3   :  { %s18_s13 = sshll.u32 %s645_s12, 4  ;;  %s28_s15 = sshll.u32 %s646_s14, 4  ;;  %s19_s13 = int_to_ptr.vmem [resolvable:$true] %s18_s13  ;;  %s29_s15 = int_to_ptr.vmem [resolvable:$true] %s28_s15 }
   0x4   :  { %s573_s18 = scalar_lea.hbm %s715_s0, 128 }
   0x5   :  { %p574_p0 = scmp.ne.s32.totalorder %s715_s0, %s573_s18  ;;  %p577_p1 = scmp.lt.u32.totalorder %s573_s18, %s715_s0 }
   0x7   :  { %p579_p2 = pnand %p577_p1, %p574_p0 }
   0x9   :  { %582 = shalt.err (!%p579_p2)
}
   0xa   :  { %s583_s23 = scalar_lea.vmem %s19_s13, 128  ;;  %p588_p4 = scmp.lt.s32.totalorder %s19_s13, %s19_s13 }
   0xb   :  { %p584_p3 = scmp.ne.s32.totalorder %s19_s13, %s583_s23  ;;  %p589_p5 = scmp.lt.s32.totalorder %s583_s23, %s583_s23 }
   0xd   :  { %p590_p6 = por %p589_p5, %p588_p4 }
   0xf   :  { %p591_p7 = pnand %p590_p6, %p584_p3 }
  0x11   :  { %594 = shalt.err (!%p591_p7)
}
  0x12   :  { %21 = dma.hbm_to_vmem [thread:$0]  %s715_s0, 128, %s19_s13, [#allocation4]  }
  0x13   :  { %s595_s28 = scalar_lea.hbm %s716_s1, 128 }
  0x14   :  { %p596_p8 = scmp.ne.s32.totalorder %s716_s1, %s595_s28  ;;  %p599_p9 = scmp.lt.u32.totalorder %s595_s28, %s716_s1 }
  0x16   :  { %p601_p10 = pnand %p599_p9, %p596_p8 }
  0x18   :  { %604 = shalt.err (!%p601_p10)
}
  0x19   :  { %s605_s6 = scalar_lea.vmem %s29_s15, 128  ;;  %p610_p12 = scmp.lt.s32.totalorder %s29_s15, %s29_s15 }
  0x1a   :  { %p606_p11 = scmp.ne.s32.totalorder %s29_s15, %s605_s6  ;;  %p611_p13 = scmp.lt.s32.totalorder %s605_s6, %s605_s6 }
  0x1c   :  { %p612_p0 = por %p611_p13, %p610_p12 }
  0x1e   :  { %p613_p1 = pnand %p612_p0, %p606_p11 }
  0x20   :  { %616 = shalt.err (!%p613_p1)
}
  0x21   :  { %31 = dma.hbm_to_vmem [thread:$0]  %s716_s1, 128, %s29_s15, [#allocation7]  }
  0x22   :  { %639 = dma.done.wait [#allocation4], 128  }
  0x23   :  { %640 = vsyncadd [#allocation4], 4294967168 }
  0x24   :  { %641 = dma.done.wait [#allocation7], 128  }
  0x25   :  { %642 = vsyncadd [#allocation7], 4294967168  ;;  %v647_v0 = vmov 0.0   ;;  %vm648_vm0 = vmmov 0   ;;  %vm42_vm1 = vcmask 261120   ;;  %v41_v1 = vld [vmem:[#allocation3] sm:$0xff]  ;;  %v496_v30 = vstv %s717_s2 }
  0x26   :  { %534 = vmatprep.subr.mxu0 %v647_v0  ;;  %539 = vmatprep.subr.mxu1 %v647_v0  ;;  %v40_v2 = vld [vmem:[#allocation6] sm:$0xff]  ;;  %v47_v3 = vsel %vm42_vm1, %v41_v1, 0  ;;  %s649_s9 = smov [#allocation8]   ;;  %vm504_vm2 = vcmask 57344  }
  0x27   :  { %536 = vmatprep.mubr.msk.f32.mxu0 %vm648_vm0, %v647_v0  ;;  %541 = vmatprep.mubr.msk.f32.mxu1 %vm648_vm0, %v647_v0  ;;  %v44_v4 = vsel %vm42_vm1, %v40_v2, 0  ;;  %v50_v5 = vand.u32 4294901760, %v47_v3  ;;  %s512_s10 = sshll.u32 %s649_s9, 4  ;;  %s513_s10 = int_to_ptr.vmem [resolvable:$true] %s512_s10 }
  0x28   :  { %v115_v6 = vand.u32 4294901760, %v44_v4  ;;  %s617_s11 = scalar_lea.vmem %s513_s10, 16  ;;  %s621_s12 = scalar_lea.vmem %s513_s10, 32 }
  0x29   :  { %535 = vmatpush3.xpose.msra.mxu0 %v50_v5  ;;  %v127_v7 = vsub.f32 %v47_v3, %v50_v5  ;;  %p618_p2 = scmp.ne.s32.totalorder %s513_s10, %s617_s11  ;;  %p622_p3 = scmp.lt.s32.totalorder %s513_s10, %s513_s10 }
  0x2a   :  { %v116_v8 = vsub.f32 %v44_v4, %v115_v6  ;;  %544 = vmatprep.subr.mxu0 %v647_v0  ;;  %p623_p4 = scmp.lt.s32.totalorder %s621_s12, %s617_s11 }
  0x2b   :  { %v128_v9 = vand.u32 4294901760, %v127_v7 }
  0x2c   :  { %v117_v10 = vand.u32 4294901760, %v116_v8  ;;  %p624_p5 = por %p623_p4, %p622_p3 }
  0x2d   :  { %v129_v11 = vsub.f32 %v127_v7, %v128_v9 }
  0x2e   :  { %v118_v12 = vsub.f32 %v116_v8, %v117_v10  ;;  %p625_p6 = pnand %p624_p5, %p618_p2 }
  0x2f   :  { %v130_v13 = vand.u32 4294901760, %v129_v11 }
  0x30   :  { %v119_v14 = vand.u32 4294901760, %v118_v12 }
  0x31   :  { %540 = vmatpush3.xpose.msra.mxu1 %v130_v13 }
  0x32   :  { %537 = vmatmul.mubr.f32.vlgmr.msra.gmra.mrb[0].mxu0 %v119_v14  ;;  %549 = vmatprep.subr.mxu1 %v647_v0 }
  0x33   :  { %545 = vmatpush3.xpose.msra.mxu0 %v127_v7  ;;  %546 = vmatprep.mubr.msk.f32.mxu0 %vm648_vm0, %v647_v0 }
  0x34   :  { %554 = vmatprep.subr.mxu0 %v647_v0  ;;  %542 = vmatmul.mubr.f32.vlgmr.msra.gmra.mrb[0].mxu1 %v115_v6 }
  0x35   :  { %550 = vmatpush3.xpose.msra.mxu1 %v50_v5  ;;  %551 = vmatprep.mubr.msk.f32.mxu1 %vm648_vm0, %v647_v0 }
  0x36   :  { %547 = vmatmul.mubr.f32.vlgmr.msra.gmra.mrb[2].mxu0 %v116_v8  ;;  %559 = vmatprep.subr.mxu1 %v647_v0 }
  0x37   :  { %555 = vmatpush3.xpose.msra.mxu0 %v128_v9  ;;  %556 = vmatprep.mubr.msk.f32.mxu0 %vm648_vm0, %v647_v0 }
  0x38   :  { %552 = vmatmul.mubr.f32.vlgmr.msra.gmra.mrb[2].mxu1 %v117_v10 }
  0x39   :  { %560 = vmatpush3.xpose.msra.mxu1 %v50_v5  ;;  %561 = vmatprep.mubr.msk.f32.mxu1 %vm648_vm0, %v647_v0 }
  0x3a   :  { %557 = vmatmul.mubr.f32.vlgmr.msra.gmra.mrb[4].mxu0 %v115_v6 }
  0x3c   :  { %562 = vmatmul.mubr.f32.vlgmr.msra.gmra.mrb[4].mxu1 %v115_v6 }
 0x105   :  { %v121_v15 = vpop.f32.mrb[0].mxu0 }
 0x106   :  { %v538_v16 = vpop.f32.mrb[1].mxu0 }
 0x107   :  { %v197_v17 = vpop.f32.mrb[0].mxu1 }
 0x108   :  { %v198_v18 = vadd.f32 %v197_v17, %v121_v15  ;;  %v543_v19 = vpop.f32.mrb[1].mxu1 }
 0x109   :  { %v271_v20 = vpop.f32.mrb[2].mxu0 }
 0x10a   :  { %v548_v21 = vpop.f32.mrb[3].mxu0  ;;  %v272_v22 = vadd.f32 %v271_v20, %v198_v18 }
 0x10b   :  { %v345_v23 = vpop.f32.mrb[2].mxu1 }
 0x10c   :  { %v346_v24 = vadd.f32 %v345_v23, %v272_v22  ;;  %v553_v25 = vpop.f32.mrb[3].mxu1 }
 0x10d   :  { %v419_v26 = vpop.f32.mrb[4].mxu0 }
 0x10e   :  { %v558_v27 = vpop.f32.mrb[5].mxu0  ;;  %v420_v28 = vadd.f32 %v419_v26, %v346_v24 }
 0x10f   :  { %v491_v29 = vpop.f32.mrb[4].mxu1 }
 0x110   :  { %v492_v31 = vadd.f32 %v491_v29, %v420_v28  ;;  %v563_v32 = vpop.f32.mrb[5].mxu1 }
 0x112   :  { %v497_v33 = vadd.f32 %v496_v30, %v492_v31 }
 0x114   :  { %v498_v34 = vsub.f32 0.0, %v497_v33 }
 0x116   :  { %v499_v35 = vmul.f32 1.442695, %v498_v34 }
 0x118   :  { %569 = vpow2.f32 %v499_v35 }
 0x122   :  { %v570_v36 = vpop.eup %569 }
 0x123   :  { %v501_v37 = vadd.f32 1.0, %v570_v36 }
 0x125   :  { %571 = vrcp.f32 %v501_v37 }
 0x12f   :  { %v572_v38 = vpop.eup %571 }
 0x130   :  { %505 = vst.msk [vmem:[#allocation8] sm:$0x1] %vm504_vm2, %v572_v38 }
 0x131   :  { %628 = shalt.err (!%p625_p6)
}
 0x132   :  { %s629_s14 = scalar_lea.hbm %s718_s3, 16 }
 0x133   :  { %p630_p7 = scmp.ne.s32.totalorder %s718_s3, %s629_s14  ;;  %p633_p8 = scmp.lt.u32.totalorder %s629_s14, %s718_s3 }
 0x135   :  { %p635_p9 = pnand %p633_p8, %p630_p7 }
 0x137   :  { %638 = shalt.err (!%p635_p9)
}
 0x138   :  { %515 = dma.vmem_to_hbm [thread:$0]  %s513_s10, 16, %s718_s3, [#allocation5]  }
 0x139   :  { %643 = dma.done.wait [#allocation5], 16  }
 0x13a   :  { %644 = vsyncadd [#allocation5], 4294967280 }
 0x13b   :  { %519 = vsyncpa [#allocation4], 1 }
 0x13c   :  { %520 = vsyncpa [#allocation7], 1 }
 0x13d   :  { %521 = vsyncpa [#allocation5], 1 }

</bundles_post_ra>
